<compile_context>
chip_gen: v5e
topology: v5e:2x2
jax: 0.10.0
libtpu: 0.0.40
codegen_flags: <defaults>
</compile_context>

<pallas_src>
import functools

import jax
import jax.numpy as jnp
from jax.experimental import pallas as pl
from jax.experimental.pallas import tpu as pltpu

_BN_EPS = 1e-5


def _round_up(a, m):
    return ((a + m - 1) // m) * m


def _mish(y):
    # Numerically stable softplus, then x * tanh(softplus(x)); EUP-friendly elementwise ops.
    sp = jnp.maximum(y, 0.0) + jnp.log(1.0 + jnp.exp(-jnp.abs(y)))
    return y * jnp.tanh(sp)


# ---------------------------------------------------------------------------
# Pallas kernels
# ---------------------------------------------------------------------------

def _mm_bn_kernel(x_ref, w_ref, b_ref, o_ref, *, mish):
    # x_ref: (TM, K) pixel rows; w_ref: (K, N) BN-folded weight; b_ref: (1, N) folded bias.
    acc = jnp.dot(x_ref[...], w_ref[...], preferred_element_type=jnp.float32)
    y = acc + b_ref[...].astype(jnp.float32)
    if mish:
        y = _mish(y)
    o_ref[...] = y.astype(o_ref.dtype)


def _mm_bn_add_kernel(x_ref, w_ref, b_ref, r_ref, o_ref):
    # Shortcut 1x1 conv + BN fused with the residual add of the conv_lighting branch.
    acc = jnp.dot(x_ref[...], w_ref[...], preferred_element_type=jnp.float32)
    y = acc + b_ref[...].astype(jnp.float32) + r_ref[...].astype(jnp.float32)
    o_ref[...] = y.astype(o_ref.dtype)


def _dw5_kernel(xp_ref, w_ref, scale_ref, bias_ref, o_ref, *, mish):
    # xp_ref: (1, H+4, W+4, C) zero-padded input (one batch); w_ref: (25, C) depthwise taps;
    # scale_ref/bias_ref: (1, C) folded BN; o_ref: (1, H, W, C).
    _, H, W, C = o_ref.shape
    acc = jnp.zeros((H, W, C), jnp.float32)
    for kh in range(5):
        for kw in range(5):
            win = xp_ref[0, kh:kh + H, kw:kw + W, :].astype(jnp.float32)   # re-read from VMEM
            acc = acc + win * w_ref[kh * 5 + kw].astype(jnp.float32)
    y = acc * scale_ref[0].astype(jnp.float32) + bias_ref[0].astype(jnp.float32)
    if mish:
        y = _mish(y)
    o_ref[0] = y.astype(o_ref.dtype)


# ---------------------------------------------------------------------------
# Pallas-backed building blocks
# ---------------------------------------------------------------------------

def _fold_bn(w2d, p):
    """Fold BN into a (Cout, K) conv weight.  Returns (K, Cout) weight and (Cout,) bias."""
    scale = p["gamma"] / jnp.sqrt(p["var"] + _BN_EPS)
    w_eff = w2d * scale[:, None]
    b_eff = p["beta"] - p["mean"] * scale
    return jnp.transpose(w_eff), b_eff


def _matmul_bn_act(rows, w_t, bias, *, mish, residual=None):
    """rows (M, K) @ w_t (K, N) + bias, optional fused Mish / residual add, tiled over rows."""
    M, K = rows.shape
    N = w_t.shape[1]
    TM = 256 if M >= 256 else _round_up(M, 8)
    Mp = _round_up(M, TM)
    pad = Mp - M
    if pad:
        rows = jnp.pad(rows, ((0, pad), (0, 0)))
        if residual is not None:
            residual = jnp.pad(residual, ((0, pad), (0, 0)))
    b2 = bias.reshape(1, N).astype(jnp.float32)

    x_spec = pl.BlockSpec((TM, K), lambda i: (i, 0))
    w_spec = pl.BlockSpec((K, N), lambda i: (0, 0))
    b_spec = pl.BlockSpec((1, N), lambda i: (0, 0))
    o_spec = pl.BlockSpec((TM, N), lambda i: (i, 0))
    cparams = pltpu.CompilerParams(
        dimension_semantics=("parallel",),
        vmem_limit_bytes=64 * 1024 * 1024,
    )
    n_res = 1 if residual is not None else 0
    cost = pl.CostEstimate(
        flops=2 * Mp * K * N,
        transcendentals=(3 * Mp * N) if mish else 0,
        bytes_accessed=4 * (Mp * K + K * N + N + (1 + n_res) * Mp * N),
    )

    if residual is None:
        out = pl.pallas_call(
            functools.partial(_mm_bn_kernel, mish=mish),
            out_shape=jax.ShapeDtypeStruct((Mp, N), rows.dtype),
            grid=(Mp // TM,),
            in_specs=[x_spec, w_spec, b_spec],
            out_specs=o_spec,
            compiler_params=cparams,
            cost_estimate=cost,
        )(rows, w_t, b2)
    else:
        r_spec = pl.BlockSpec((TM, N), lambda i: (i, 0))
        out = pl.pallas_call(
            _mm_bn_add_kernel,
            out_shape=jax.ShapeDtypeStruct((Mp, N), rows.dtype),
            grid=(Mp // TM,),
            in_specs=[x_spec, w_spec, b_spec, r_spec],
            out_specs=o_spec,
            compiler_params=cparams,
            cost_estimate=cost,
        )(rows, w_t, b2, residual)
    return out[:M] if pad else out


def _conv1x1_bn(x_nhwc, p, *, mish, residual_rows=None):
    B, H, W, Cin = x_nhwc.shape
    Cout = p["w"].shape[0]
    w_t, b = _fold_bn(p["w"].reshape(Cout, Cin), p)
    rows = x_nhwc.reshape(B * H * W, Cin)
    out = _matmul_bn_act(rows, w_t, b, mish=mish, residual=residual_rows)
    return out.reshape(B, H, W, Cout)


def _conv3x3_bn(x_nhwc, p, *, mish):
    # 3x3 'same' conv as im2col (wrapper-side layout op) + the tiled Pallas matmul kernel.
    B, H, W, Cin = x_nhwc.shape
    Cout = p["w"].shape[0]
    xpad = jnp.pad(x_nhwc, ((0, 0), (1, 1), (1, 1), (0, 0)))
    patches = jnp.concatenate(
        [xpad[:, dh:dh + H, dw:dw + W, :] for dh in range(3) for dw in range(3)],
        axis=-1,
    )                                                     # (B, H, W, 9*Cin), tap-major
    w_flat = jnp.transpose(p["w"], (0, 2, 3, 1)).reshape(Cout, 9 * Cin)
    w_t, b = _fold_bn(w_flat, p)
    rows = patches.reshape(B * H * W, 9 * Cin)
    out = _matmul_bn_act(rows, w_t, b, mish=mish)
    return out.reshape(B, H, W, Cout)


def _dwconv5_bn(x_nhwc, p, *, mish):
    B, H, W, C = x_nhwc.shape
    xpad = jnp.pad(x_nhwc, ((0, 0), (2, 2), (2, 2), (0, 0)))
    w25 = p["w"].reshape(C, 25).T                          # (25, C), row = kh*5+kw
    scale = (p["gamma"] / jnp.sqrt(p["var"] + _BN_EPS)).reshape(1, C).astype(jnp.float32)
    bias = (p["beta"] - p["mean"] * scale[0]).reshape(1, C).astype(jnp.float32)

    cost = pl.CostEstimate(
        flops=2 * B * H * W * C * 25,
        transcendentals=(3 * B * H * W * C) if mish else 0,
        bytes_accessed=4 * (B * (H + 4) * (W + 4) * C + B * H * W * C + 25 * C + 2 * C),
    )
    return pl.pallas_call(
        functools.partial(_dw5_kernel, mish=mish),
        out_shape=jax.ShapeDtypeStruct((B, H, W, C), x_nhwc.dtype),
        grid=(B,),
        in_specs=[
            pl.BlockSpec((1, H + 4, W + 4, C), lambda b: (b, 0, 0, 0)),
            pl.BlockSpec((25, C), lambda b: (0, 0)),
            pl.BlockSpec((1, C), lambda b: (0, 0)),
            pl.BlockSpec((1, C), lambda b: (0, 0)),
        ],
        out_specs=pl.BlockSpec((1, H, W, C), lambda b: (b, 0, 0, 0)),
        compiler_params=pltpu.CompilerParams(
            dimension_semantics=("parallel",),
            vmem_limit_bytes=64 * 1024 * 1024,
        ),
        cost_estimate=cost,
    )(xpad, w25, scale, bias)


def _shuffle_concat(x1, z):
    # torch: cat on channels, reshape/permute shuffle => out = [x2[..., 0::2], x2[..., 1::2]].
    xc = jnp.concatenate([x1, z], axis=-1)
    return jnp.concatenate([xc[..., 0::2], xc[..., 1::2]], axis=-1)


def gs_bottleneck(x_nchw, params):
    """Pallas-backed GSBottleneck forward.  x_nchw: (B, c1, H, W)."""
    B, c1, H, W = x_nchw.shape
    x = jnp.transpose(x_nchw, (0, 2, 3, 1))               # NHWC (channels on lanes)

    # GSConv #1 (1x1, Mish)
    h1 = _conv1x1_bn(x, params["gs1_cv1"], mish=True)
    z1 = _dwconv5_bn(h1, params["gs1_cv2"], mish=True)
    g1 = _shuffle_concat(h1, z1)

    # GSConv #2 (3x3, act=False)
    h2 = _conv3x3_bn(g1, params["gs2_cv1"], mish=False)
    z2 = _dwconv5_bn(h2, params["gs2_cv2"], mish=False)
    g2 = _shuffle_concat(h2, z2)

    # Shortcut 1x1 conv + BN, fused with the residual add.
    c2 = params["sc"]["w"].shape[0]
    res_rows = g2.reshape(B * H * W, c2)
    out = _conv1x1_bn(x, params["sc"], mish=False, residual_rows=res_rows)
    return jnp.transpose(out, (0, 3, 1, 2))                # back to NCHW


# ---------------------------------------------------------------------------
# Plain-JAX reference mirroring the PyTorch module exactly
# ---------------------------------------------------------------------------

def _conv_bn_ref(x, p, *, pad, groups=1, mish):
    y = jax.lax.conv_general_dilated(
        x, p["w"], window_strides=(1, 1), padding=[(pad, pad), (pad, pad)],
        dimension_numbers=("NCHW", "OIHW", "NCHW"), feature_group_count=groups)
    scale = p["gamma"] / jnp.sqrt(p["var"] + _BN_EPS)
    y = y * scale[None, :, None, None] + (p["beta"] - p["mean"] * scale)[None, :, None, None]
    if mish:
        y = y * jnp.tanh(jax.nn.softplus(y))
    return y


def _gsconv_ref(x, p_cv1, p_cv2, *, k, mish):
    x1 = _conv_bn_ref(x, p_cv1, pad=k // 2, groups=1, mish=mish)
    z = _conv_bn_ref(x1, p_cv2, pad=2, groups=x1.shape[1], mish=mish)
    x2 = jnp.concatenate([x1, z], axis=1)
    b, n, h, w = x2.shape
    y = x2.reshape(b * n // 2, 2, h * w)
    y = jnp.transpose(y, (1, 0, 2))
    y = y.reshape(2, -1, n // 2, h, w)
    return jnp.concatenate([y[0], y[1]], axis=1)


def gs_bottleneck_ref(x, params):
    g1 = _gsconv_ref(x, params["gs1_cv1"], params["gs1_cv2"], k=1, mish=True)
    g2 = _gsconv_ref(g1, params["gs2_cv1"], params["gs2_cv2"], k=3, mish=False)
    sc = _conv_bn_ref(x, params["sc"], pad=0, groups=1, mish=False)
    return g2 + sc


# ---------------------------------------------------------------------------
# Demo / self-check
# ---------------------------------------------------------------------------

if __name__ == "__main__":
    B, c1, c2, H, W = 2, 16, 16, 16, 16
    e = 0.5
    c_ = int(c2 * e)       # 8  (hidden width of conv_lighting)
    ch1 = c_ // 2          # 4  (GSConv #1 half width)
    ch2 = c2 // 2          # 8  (GSConv #2 half width)

    key = jax.random.PRNGKey(0)
    keys = jax.random.split(key, 32)
    kit = iter(keys)

    def make_conv(cout, cin, k, groups=1):
        return dict(
            w=0.1 * jax.random.normal(next(kit), (cout, cin // groups, k, k), jnp.float32),
            gamma=1.0 + 0.1 * jax.random.normal(next(kit), (cout,), jnp.float32),
            beta=0.1 * jax.random.normal(next(kit), (cout,), jnp.float32),
            mean=0.1 * jax.random.normal(next(kit), (cout,), jnp.float32),
            var=0.5 + jax.random.uniform(next(kit), (cout,), jnp.float32),
        )

    params = {
        "gs1_cv1": make_conv(ch1, c1, 1),                 # Conv(c1, c_/2, 1) + BN + Mish
        "gs1_cv2": make_conv(ch1, ch1, 5, groups=ch1),    # DW 5x5 + BN + Mish
        "gs2_cv1": make_conv(ch2, c_, 3),                 # Conv(c_, c2/2, 3) + BN (no act)
        "gs2_cv2": make_conv(ch2, ch2, 5, groups=ch2),    # DW 5x5 + BN (no act)
        "sc": make_conv(c2, c1, 1),                       # shortcut Conv(c1, c2, 1) + BN (no act)
    }

    x = jax.random.normal(next(kit), (B, c1, H, W), jnp.float32)

    out = gs_bottleneck(x, params)
    out = jax.block_until_ready(out)

    ref = gs_bottleneck_ref(x, params)
    assert out.shape == (B, c2, H, W)
    max_err = float(jnp.max(jnp.abs(out - ref)))
    assert jnp.allclose(out, ref, atol=1e-4, rtol=1e-4), f"mismatch vs reference: {max_err}"

    print("KERNEL_OK")
</pallas_src>

<mosaic_0001>
module attributes {stable_mosaic.version = 11 : i64} {
  func.func @_mm_bn_kernel(%arg0: i32, %arg1: memref<256x16xf32, #tpu.memory_space<vmem>>, %arg2: memref<16x4xf32, #tpu.memory_space<vmem>>, %arg3: memref<1x4xf32, #tpu.memory_space<vmem>>, %arg4: memref<256x4xf32, #tpu.memory_space<vmem>>) attributes {dimension_semantics = [#tpu.dimension_semantics<parallel>], iteration_bounds = array<i64: 2>, scalar_prefetch = 0 : i64, scratch_operands = 0 : i64, tpu.core_type = #tpu.core_type<tc>, window_params = [{transform_indices = @transform_0, window_bounds = array<i64: 256, 16>}, {pipeline_mode = #tpu.pipeline_mode<synchronous>, transform_indices = @transform_1, window_bounds = array<i64: 16, 4>}, {pipeline_mode = #tpu.pipeline_mode<synchronous>, transform_indices = @transform_2, window_bounds = array<i64: 1, 4>}, {transform_indices = @transform_3, window_bounds = array<i64: 256, 4>}]} {
    %c0 = arith.constant 0 : index
    %c0_0 = arith.constant 0 : index
    %0 = vector.load %arg1[%c0, %c0_0] : memref<256x16xf32, #tpu.memory_space<vmem>>, vector<256x16xf32>
    %c0_1 = arith.constant 0 : index
    %c0_2 = arith.constant 0 : index
    %1 = vector.load %arg2[%c0_1, %c0_2] : memref<16x4xf32, #tpu.memory_space<vmem>>, vector<16x4xf32>
    %cst = arith.constant dense<0.000000e+00> : vector<256x4xf32>
    %2 = tpu.matmul %0, %1, %cst {dimension_numbers = #tpu.dot_dimension_numbers<[1], [0], [0], [1], [0, 0, 1, 1], [], []>} : vector<256x16xf32>, vector<16x4xf32>, vector<256x4xf32> -> vector<256x4xf32>
    %c0_3 = arith.constant 0 : index
    %c0_4 = arith.constant 0 : index
    %3 = vector.load %arg3[%c0_3, %c0_4] : memref<1x4xf32, #tpu.memory_space<vmem>>, vector<1x4xf32>
    %4 = vector.broadcast %3 : vector<1x4xf32> to vector<256x4xf32>
    %5 = arith.addf %2, %4 : vector<256x4xf32>
    %cst_5 = arith.constant 0.000000e+00 : f32
    %6 = vector.broadcast %cst_5 : f32 to vector<256x4xf32>
    %7 = arith.maximumf %5, %6 : vector<256x4xf32>
    %8 = math.absf %5 : vector<256x4xf32>
    %cst_6 = arith.constant 0.000000e+00 : f32
    %9 = vector.broadcast %cst_6 : f32 to vector<256x4xf32>
    %10 = arith.subf %9, %8 : vector<256x4xf32>
    %11 = math.exp %10 : vector<256x4xf32>
    %cst_7 = arith.constant 1.000000e+00 : f32
    %12 = vector.broadcast %cst_7 : f32 to vector<256x4xf32>
    %13 = arith.addf %12, %11 : vector<256x4xf32>
    %14 = math.log %13 : vector<256x4xf32>
    %15 = arith.addf %7, %14 : vector<256x4xf32>
    %16 = math.tanh %15 : vector<256x4xf32>
    %17 = arith.mulf %5, %16 : vector<256x4xf32>
    %c0_8 = arith.constant 0 : index
    %c0_9 = arith.constant 0 : index
    %18 = vector.load %arg4[%c0_8, %c0_9] : memref<256x4xf32, #tpu.memory_space<vmem>>, vector<256x4xf32>
    tpu.vector_store %arg4[%c0_8, %c0_9], %17 {strides = array<i32>} : memref<256x4xf32, #tpu.memory_space<vmem>>, vector<256x4xf32>,
    return
  }
  func.func @transform_0(%arg0: i32) -> (i32, i32) {
    %c0_i32 = arith.constant 0 : i32
    %c0_i32_0 = arith.constant 0 : i32
    return %arg0, %c0_i32 : i32, i32
  }
  func.func @transform_1(%arg0: i32) -> (i32, i32) {
    %c0_i32 = arith.constant 0 : i32
    %c0_i32_0 = arith.constant 0 : i32
    %c0_i32_1 = arith.constant 0 : i32
    return %c0_i32, %c0_i32_0 : i32, i32
  }
  func.func @transform_2(%arg0: i32) -> (i32, i32) {
    %c0_i32 = arith.constant 0 : i32
    %c0_i32_0 = arith.constant 0 : i32
    %c0_i32_1 = arith.constant 0 : i32
    return %c0_i32, %c0_i32_0 : i32, i32
  }
  func.func @transform_3(%arg0: i32) -> (i32, i32) {
    %c0_i32 = arith.constant 0 : i32
    %c0_i32_0 = arith.constant 0 : i32
    return %arg0, %c0_i32 : i32, i32
  }
}

</mosaic_0001>

<bundles_post_ra>
// kernel: tpu_custom_call.1
= control target key start
LH: loop header
LB: loop body
LE: loop exit
PB: predicated region body
PF: predicated region fallthrough
CT: control target
= control target key end

     0   :  { %s1141_s12 = smov 0   ;;  %s1502_s0 = inlined_call_operand.vmem [shape: f32[512,16], index: 0, kind: input, shape index: {}]   ;;  %s1503_s1 = inlined_call_operand.vmem [shape: f32[16,4], index: 1, kind: input, shape index: {}]   ;;  %s1504_s2 = inlined_call_operand.vmem [shape: f32[1,4], index: 2, kind: input, shape index: {}]   ;;  %s1505_s3 = inlined_call_operand.vmem [shape: f32[512,4], index: 3, kind: output, shape index: {}]  }
   0x1 LB: > { %s863_s13 = sadd.s32 4294967295, %s1119_s12   ;;  %p867_p0 = scmp.ge.s32.totalorder %s1119_s12, 1  ;;  %s1119_s12 = sphi %s1141_s12, %s13_s12  }
   0x2   : > { %p138_p1 = scmp.lt.s32.totalorder %s1119_s12, 3 }
   0x4   : > { %p139_p2 = pnand %p867_p0, %p138_p1 }
   0x5   : > { %s868_s18 = sshll.u32 (!%p139_p2), %s863_s13, 5 }
   0x6   : > { %142 = sbr.rel (%p139_p2) target bundleno = 273 (0x111), region = 32  ;;  %p163_p3 = scmp.lt.s32.totalorder (!%p139_p2), %s868_s18, 63 }
   0xb   : > { %v207_v0 = vld [vmem:[%s1503_s1 + $0x8] sm:$0xff]  ;;  %v206_v1 = vld [vmem:[%s1503_s1] sm:$0xff]  ;;  %s1507_s18 = smov (!%p163_p3, %s868_s18), 63  ;;  %vm212_vm0 = vcmask 130048   ;;  %vm774_vm1 = vcmask 31744  }
   0xc   : > { %323 = vmatpush.msra.mxu0 %v207_v0  ;;  %906 = vmatpush.msra.mxu1 %v207_v0  ;;  %s869_s19 = sshll.u32 %s1507_s18, 3  ;;  %v1232_v34 = vld [vmem:[%s1504_s2] ss:$0 sm:$0xff] }
   0xd   : > { %907 = vmatpush.msra.mxu2 %v207_v0  ;;  %908 = vmatpush.msra.mxu3 %v207_v0  ;;  %s1163_s22 = scalar_lea.vmem %s1502_s0, %s869_s19  ;;  %s1301_s27 = scalar_lea.vmem %s1505_s3, %s869_s19 }
   0xe   : > { %324 = vmatpush.msra.mxu0 %v206_v1  ;;  %909 = vmatpush.msra.mxu1 %v206_v1  ;;  %v174_v2 = vld [vmem:[%s1163_s22] sm:$0xff]  ;;  %v175_v6 = vld [vmem:[%s1163_s22 + $0x8] sm:$0xff]  ;;  %v176_v10 = vld [vmem:[%s1163_s22 + $0x10] sm:$0xff] }
   0xf   : > { %910 = vmatpush.msra.mxu2 %v206_v1  ;;  %911 = vmatpush.msra.mxu3 %v206_v1  ;;  %v182_v3 = vld [vmem:[%s1163_s22 + $0x40] sm:$0xff]  ;;  %v183_v7 = vld [vmem:[%s1163_s22 + $0x48] sm:$0xff]  ;;  %v184_v11 = vld [vmem:[%s1163_s22 + $0x50] sm:$0xff] }
  0x10   : > { %v190_v4 = vld [vmem:[%s1163_s22 + $0x80] sm:$0xff]  ;;  %872 = vmatmul.msk.f32.vlgmr.msra.gmra.mxu0 %vm212_vm0, %v174_v2  ;;  %880 = vmatmul.msk.f32.vlgmr.msra.gmra.mxu1 %vm212_vm0, %v182_v3  ;;  %v191_v8 = vld [vmem:[%s1163_s22 + $0x88] sm:$0xff]  ;;  %v192_v12 = vld [vmem:[%s1163_s22 + $0x90] sm:$0xff] }
  0x11   : > { %v198_v5 = vld [vmem:[%s1163_s22 + $0xc0] sm:$0xff]  ;;  %888 = vmatmul.msk.f32.vlgmr.msra.gmra.mxu2 %vm212_vm0, %v190_v4  ;;  %v199_v9 = vld [vmem:[%s1163_s22 + $0xc8] sm:$0xff]  ;;  %v200_v13 = vld [vmem:[%s1163_s22 + $0xd0] sm:$0xff] }
  0x12   : > { %896 = vmatmul.msk.f32.vlgmr.msra.gmra.mxu3 %vm212_vm0, %v198_v5  ;;  %v177_v14 = vld [vmem:[%s1163_s22 + $0x18] sm:$0xff]  ;;  %v178_v18 = vld [vmem:[%s1163_s22 + $0x20] sm:$0xff]  ;;  %v179_v22 = vld [vmem:[%s1163_s22 + $0x28] sm:$0xff] }
  0x13   : > { %v185_v15 = vld [vmem:[%s1163_s22 + $0x58] sm:$0xff]  ;;  %v186_v19 = vld [vmem:[%s1163_s22 + $0x60] sm:$0xff]  ;;  %v187_v23 = vld [vmem:[%s1163_s22 + $0x68] sm:$0xff] }
  0x14   : > { %v193_v16 = vld [vmem:[%s1163_s22 + $0x98] sm:$0xff]  ;;  %v194_v20 = vld [vmem:[%s1163_s22 + $0xa0] sm:$0xff]  ;;  %v195_v24 = vld [vmem:[%s1163_s22 + $0xa8] sm:$0xff] }
  0x15   : > { %v201_v17 = vld [vmem:[%s1163_s22 + $0xd8] sm:$0xff]  ;;  %v202_v21 = vld [vmem:[%s1163_s22 + $0xe0] sm:$0xff]  ;;  %v203_v25 = vld [vmem:[%s1163_s22 + $0xe8] sm:$0xff] }
  0x16   : > { %v180_v26 = vld [vmem:[%s1163_s22 + $0x30] sm:$0xff]  ;;  %v181_v30 = vld [vmem:[%s1163_s22 + $0x38] sm:$0xff] }
  0x17   : > { %v188_v27 = vld [vmem:[%s1163_s22 + $0x70] sm:$0xff]  ;;  %v189_v31 = vld [vmem:[%s1163_s22 + $0x78] sm:$0xff] }
  0x18   : > { %873 = vmatmul.msk.f32.gmra.mxu0 %vm212_vm0, %v175_v6  ;;  %881 = vmatmul.msk.f32.gmra.mxu1 %vm212_vm0, %v183_v7  ;;  %v196_v28 = vld [vmem:[%s1163_s22 + $0xb0] sm:$0xff]  ;;  %v197_v32 = vld [vmem:[%s1163_s22 + $0xb8] sm:$0xff] }
  0x19   : > { %889 = vmatmul.msk.f32.gmra.mxu2 %vm212_vm0, %v191_v8  ;;  %v204_v29 = vld [vmem:[%s1163_s22 + $0xf0] sm:$0xff]  ;;  %v205_v33 = vld [vmem:[%s1163_s22 + $0xf8] sm:$0xff] }
  0x1a   : > { %897 = vmatmul.msk.f32.gmra.mxu3 %vm212_vm0, %v199_v9 }
  0x20   : > { %874 = vmatmul.msk.f32.gmra.mxu0 %vm212_vm0, %v176_v10  ;;  %882 = vmatmul.msk.f32.gmra.mxu1 %vm212_vm0, %v184_v11 }
  0x21   : > { %890 = vmatmul.msk.f32.gmra.mxu2 %vm212_vm0, %v192_v12 }
  0x22   : > { %898 = vmatmul.msk.f32.gmra.mxu3 %vm212_vm0, %v200_v13 }
  0x28   : > { %875 = vmatmul.msk.f32.gmra.mxu0 %vm212_vm0, %v177_v14  ;;  %883 = vmatmul.msk.f32.gmra.mxu1 %vm212_vm0, %v185_v15 }
  0x29   : > { %891 = vmatmul.msk.f32.gmra.mxu2 %vm212_vm0, %v193_v16 }
  0x2a   : > { %899 = vmatmul.msk.f32.gmra.mxu3 %vm212_vm0, %v201_v17 }
  0x30   : > { %876 = vmatmul.msk.f32.gmra.mxu0 %vm212_vm0, %v178_v18  ;;  %884 = vmatmul.msk.f32.gmra.mxu1 %vm212_vm0, %v186_v19 }
  0x31   : > { %892 = vmatmul.msk.f32.gmra.mxu2 %vm212_vm0, %v194_v20 }
  0x32   : > { %900 = vmatmul.msk.f32.gmra.mxu3 %vm212_vm0, %v202_v21 }
  0x38   : > { %877 = vmatmul.msk.f32.gmra.mxu0 %vm212_vm0, %v179_v22  ;;  %885 = vmatmul.msk.f32.gmra.mxu1 %vm212_vm0, %v187_v23 }
  0x39   : > { %893 = vmatmul.msk.f32.gmra.mxu2 %vm212_vm0, %v195_v24 }
  0x3a   : > { %901 = vmatmul.msk.f32.gmra.mxu3 %vm212_vm0, %v203_v25 }
  0x40   : > { %878 = vmatmul.msk.f32.gmra.mxu0 %vm212_vm0, %v180_v26  ;;  %886 = vmatmul.msk.f32.gmra.mxu1 %vm212_vm0, %v188_v27 }
  0x41   : > { %894 = vmatmul.msk.f32.gmra.mxu2 %vm212_vm0, %v196_v28 }
  0x42   : > { %902 = vmatmul.msk.f32.gmra.mxu3 %vm212_vm0, %v204_v29 }
  0x48   : > { %879 = vmatmul.msk.f32.gmra.mxu0 %vm212_vm0, %v181_v30  ;;  %887 = vmatmul.msk.f32.gmra.mxu1 %vm212_vm0, %v189_v31 }
  0x49   : > { %895 = vmatmul.msk.f32.gmra.mxu2 %vm212_vm0, %v197_v32 }
  0x4a   : > { %903 = vmatmul.msk.f32.gmra.mxu3 %vm212_vm0, %v205_v33 }
  0x8d   : > { %v326_v35 = vpop.f32.mrf.mxu0  ;;  %v350_v36 = vpop.f32.mrf.mxu1 }
  0x8e   : > { %v1235_v37 = vadd.f32 %v1232_v34, %v326_v35  ;;  %v1238_v38 = vadd.f32 %v1232_v34, %v350_v36 }
  0x90   : > { %v454_v39 = vand.u32 2147483647, %v1235_v37  ;;  %v462_v40 = vand.u32 2147483647, %v1238_v38  ;;  %v422_v23 = vmax.f32 %v1235_v37, 0.0  ;;  %v430_v35 = vmax.f32 %v1238_v38, 0.0 }
  0x92   : > { %v486_v41 = vsub.f32 0.0, %v454_v39  ;;  %v494_v42 = vsub.f32 0.0, %v462_v40 }
  0x94   : > { %v518_v43 = vmul.f32 1.442695, %v486_v41  ;;  %v534_v44 = vmul.f32 1.442695, %v494_v42  ;;  %v374_v45 = vpop.f32.mrf.mxu2 }
  0x95   : > { %v398_v46 = vpop.f32.mrf.mxu3  ;;  %v1243_v47 = vadd.f32 %v1232_v34, %v374_v45  ;;  %v329_v49 = vpop.f32.mrf.mxu0 }
  0x96   : > { %v1246_v48 = vadd.f32 %v1232_v34, %v398_v46  ;;  %v353_v50 = vpop.f32.mrf.mxu1  ;;  %921 = vpow2.f32 %v518_v43  ;;  %v1249_v51 = vadd.f32 %v1232_v34, %v329_v49 }
  0x97   : > { %v1252_v52 = vadd.f32 %v1232_v34, %v353_v50  ;;  %923 = vpow2.f32 %v534_v44  ;;  %v470_v53 = vand.u32 2147483647, %v1243_v47 }
  0x98   : > { %v478_v54 = vand.u32 2147483647, %v1246_v48  ;;  %v455_v55 = vand.u32 2147483647, %v1249_v51 }
  0x99   : > { %v502_v56 = vsub.f32 0.0, %v470_v53  ;;  %v463_v57 = vand.u32 2147483647, %v1252_v52 }
  0x9a   : > { %v510_v58 = vsub.f32 0.0, %v478_v54  ;;  %v487_v59 = vsub.f32 0.0, %v455_v55  ;;  %v438_v55 = vmax.f32 %v1243_v47, 0.0 }
  0x9b   : > { %v550_v60 = vmul.f32 1.442695, %v502_v56  ;;  %v495_v61 = vsub.f32 0.0, %v463_v57 }
  0x9c   : > { %v922_v62 = vpop.eup %921  ;;  %v566_v63 = vmul.f32 1.442695, %v510_v58  ;;  %v520_v0 = vmul.f32 1.442695, %v487_v59  ;;  %v377_v1 = vpop.f32.mrf.mxu2  ;;  %v446_v59 = vmax.f32 %v1246_v48, 0.0 }
  0x9d   : > { %v401_v2 = vpop.f32.mrf.mxu3  ;;  %v924_v3 = vpop.eup %923  ;;  %v582_v4 = vadd.f32 1.0, %v922_v62  ;;  %925 = vpow2.f32 %v550_v60  ;;  %v536_v5 = vmul.f32 1.442695, %v495_v61  ;;  %v1259_v6 = vadd.f32 %v1232_v34, %v377_v1 }
  0x9e   : > { %v332_v7 = vpop.f32.mrf.mxu0  ;;  %v356_v8 = vpop.f32.mrf.mxu1  ;;  %v590_v9 = vadd.f32 1.0, %v924_v3  ;;  %927 = vpow2.f32 %v566_v63  ;;  %v1262_v10 = vadd.f32 %v1232_v34, %v401_v2  ;;  %v423_v60 = vmax.f32 %v1249_v51, 0.0 }
  0x9f   : > { %v1265_v11 = vadd.f32 %v1232_v34, %v332_v7  ;;  %929 = vlog2.f32 %v582_v4  ;;  %v471_v12 = vand.u32 2147483647, %v1259_v6  ;;  %v1269_v13 = vadd.f32 %v1232_v34, %v356_v8 }
  0xa0   : > { %931 = vlog2.f32 %v590_v9  ;;  %v479_v14 = vand.u32 2147483647, %v1262_v10  ;;  %v431_v9 = vmax.f32 %v1252_v52, 0.0 }
  0xa1   : > { %933 = vpow2.f32 %v520_v0  ;;  %v503_v15 = vsub.f32 0.0, %v471_v12  ;;  %v456_v16 = vand.u32 2147483647, %v1265_v11  ;;  %v464_v21 = vand.u32 2147483647, %v1269_v13 }
  0xa2   : > { %935 = vpow2.f32 %v536_v5  ;;  %v511_v17 = vsub.f32 0.0, %v479_v14  ;;  %v439_v12 = vmax.f32 %v1259_v6, 0.0 }
  0xa3   : > { %v926_v18 = vpop.eup %925  ;;  %v552_v19 = vmul.f32 1.442695, %v503_v15  ;;  %v488_v20 = vsub.f32 0.0, %v456_v16  ;;  %v496_v41 = vsub.f32 0.0, %v464_v21 }
  0xa4   : > { %v928_v22 = vpop.eup %927  ;;  %v598_v24 = vadd.f32 1.0, %v926_v18  ;;  %v568_v25 = vmul.f32 1.442695, %v511_v17  ;;  %v380_v26 = vpop.f32.mrf.mxu2 }
  0xa5   : > { %v404_v27 = vpop.f32.mrf.mxu3  ;;  %v930_v28 = vpop.eup %929  ;;  %v606_v29 = vadd.f32 1.0, %v928_v22  ;;  %937 = vpow2.f32 %v552_v19  ;;  %v522_v30 = vmul.f32 1.442695, %v488_v20  ;;  %v1276_v31 = vadd.f32 %v1232_v34, %v380_v26 }
  0xa6   : > { %v932_v32 = vpop.eup %931  ;;  %v615_v33 = vmul.f32 0.6931472, %v930_v28  ;;  %939 = vlog2.f32 %v598_v24  ;;  %v1280_v36 = vadd.f32 %v1232_v34, %v404_v27  ;;  %v335_v43 = vpop.f32.mrf.mxu0  ;;  %v538_v61 = vmul.f32 1.442695, %v496_v41 }
  0xa7   : > { %v934_v39 = vpop.eup %933  ;;  %v631_v40 = vmul.f32 0.6931472, %v932_v32  ;;  %941 = vlog2.f32 %v606_v29  ;;  %v472_v42 = vand.u32 2147483647, %v1276_v31  ;;  %v359_v54 = vpop.f32.mrf.mxu1  ;;  %v1286_v57 = vadd.f32 %v1232_v34, %v335_v43 }
  0xa8   : > { %v936_v44 = vpop.eup %935  ;;  %v678_v45 = vadd.f32 %v615_v33, %v422_v23  ;;  %v583_v46 = vadd.f32 1.0, %v934_v39  ;;  %943 = vpow2.f32 %v568_v25  ;;  %v480_v56 = vand.u32 2147483647, %v1280_v36 }
  0xa9   : > { %v686_v49 = vadd.f32 %v631_v40, %v430_v35  ;;  %v591_v50 = vadd.f32 1.0, %v936_v44  ;;  %945 = vpow2.f32 %v522_v30  ;;  %v504_v53 = vsub.f32 0.0, %v472_v42 }
  0xaa   : > { %947 = vtanh.f32 %v678_v45  ;;  %v1291_v1 = vadd.f32 %v1232_v34, %v359_v54  ;;  %v512_v4 = vsub.f32 0.0, %v480_v56  ;;  %v457_v5 = vand.u32 2147483647, %v1286_v57 }
  0xab   : > { %v938_v58 = vpop.eup %937  ;;  %949 = vtanh.f32 %v686_v49  ;;  %v554_v0 = vmul.f32 1.442695, %v504_v53 }
  0xac   : > { %v940_v62 = vpop.eup %939  ;;  %951 = vlog2.f32 %v583_v46  ;;  %v599_v63 = vadd.f32 1.0, %v938_v58  ;;  %v383_v14 = vpop.f32.mrf.mxu2  ;;  %v489_v18 = vsub.f32 0.0, %v457_v5  ;;  %v465_v23 = vand.u32 2147483647, %v1291_v1 }
  0xad   : > { %v942_v2 = vpop.eup %941  ;;  %v647_v3 = vmul.f32 0.6931472, %v940_v62  ;;  %953 = vlog2.f32 %v591_v50  ;;  %v407_v19 = vpop.f32.mrf.mxu3  ;;  %v570_v26 = vmul.f32 1.442695, %v512_v4  ;;  %v1306_v27 = vadd.f32 %v1232_v34, %v383_v14 }
  0xae   : > { %v944_v7 = vpop.eup %943  ;;  %v663_v8 = vmul.f32 0.6931472, %v942_v2  ;;  %955 = vlog2.f32 %v599_v63  ;;  %v524_v30 = vmul.f32 1.442695, %v489_v18  ;;  %v1310_v32 = vadd.f32 %v1232_v34, %v407_v19  ;;  %v338_v43 = vpop.f32.mrf.mxu0 }
  0xaf   : > { %v946_v15 = vpop.eup %945  ;;  %v694_v16 = vadd.f32 %v647_v3, %v438_v55  ;;  %v607_v17 = vadd.f32 1.0, %v944_v7  ;;  %957 = vpow2.f32 %v538_v61  ;;  %v473_v39 = vand.u32 2147483647, %v1306_v27  ;;  %v362_v56 = vpop.f32.mrf.mxu1 }
  0xb0   : > { %v948_v20 = vpop.eup %947  ;;  %v702_v21 = vadd.f32 %v663_v8, %v446_v59  ;;  %v584_v22 = vadd.f32 1.0, %v946_v15  ;;  %959 = vpow2.f32 %v554_v0  ;;  %v497_v42 = vsub.f32 0.0, %v465_v23 }
  0xb1   : > { %v950_v24 = vpop.eup %949  ;;  %v742_v25 = vmul.f32 %v948_v20, %v1235_v37  ;;  %961 = vtanh.f32 %v694_v16  ;;  %v447_v37 = vmax.f32 %v1262_v10, 0.0  ;;  %v505_v49 = vsub.f32 0.0, %v473_v39 }
  0xb2   : > { %v952_v28 = vpop.eup %951  ;;  %v750_v29 = vmul.f32 %v950_v24, %v1238_v38  ;;  %963 = vtanh.f32 %v702_v21  ;;  %v424_v38 = vmax.f32 %v1265_v11, 0.0  ;;  %v481_v55 = vand.u32 2147483647, %v1310_v32 }
  0xb3   : > { %v954_v33 = vpop.eup %953  ;;  %775 = vst.msk [vmem:[%s1301_s27] sm:$0xff] %vm774_vm1, %v742_v25  ;;  %v617_v35 = vmul.f32 0.6931472, %v952_v28  ;;  %965 = vlog2.f32 %v607_v17  ;;  %v432_v61 = vmax.f32 %v1269_v13, 0.0  ;;  %v540_v0 = vmul.f32 1.442695, %v497_v42 }
  0xb4   : > { %v956_v40 = vpop.eup %955  ;;  %783 = vst.msk [vmem:[%s1301_s27 + $0x40] sm:$0xff] %vm774_vm1, %v750_v29  ;;  %v633_v41 = vmul.f32 0.6931472, %v954_v33  ;;  %967 = vlog2.f32 %v584_v22  ;;  %v1323_v2 = vadd.f32 %v1232_v34, %v338_v43  ;;  %v386_v3 = vpop.f32.mrf.mxu2  ;;  %v556_v7 = vmul.f32 1.442695, %v505_v49 }
  0xb5   : > { %v958_v44 = vpop.eup %957  ;;  %v679_v45 = vadd.f32 %v617_v35, %v423_v60  ;;  %v649_v46 = vmul.f32 0.6931472, %v956_v40  ;;  %969 = vpow2.f32 %v570_v26  ;;  %v1327_v8 = vadd.f32 %v1232_v34, %v362_v56  ;;  %v410_v22 = vpop.f32.mrf.mxu3 }
  0xb6   : > { %v960_v50 = vpop.eup %959  ;;  %v687_v53 = vadd.f32 %v633_v41, %v431_v9  ;;  %v592_v54 = vadd.f32 1.0, %v958_v44  ;;  %971 = vpow2.f32 %v524_v30  ;;  %v458_v14 = vand.u32 2147483647, %v1323_v2  ;;  %v341_v35 = vpop.f32.mrf.mxu0 }
  0xb7   : > { %v962_v58 = vpop.eup %961  ;;  %973 = vtanh.f32 %v679_v45  ;;  %v695_v59 = vadd.f32 %v649_v46, %v439_v12  ;;  %v600_v62 = vadd.f32 1.0, %v960_v50  ;;  %v1336_v17 = vadd.f32 %v1232_v34, %v386_v3  ;;  %v365_v44 = vpop.f32.mrf.mxu1 }
  0xb8   : > { %v964_v63 = vpop.eup %963  ;;  %v758_v60 = vmul.f32 %v962_v58, %v1243_v47  ;;  %975 = vtanh.f32 %v687_v53  ;;  %v513_v47 = vsub.f32 0.0, %v481_v55  ;;  %v490_v21 = vsub.f32 0.0, %v458_v14 }
  0xb9   : > { %v966_v4 = vpop.eup %965  ;;  %v766_v5 = vmul.f32 %v964_v63, %v1246_v48  ;;  %977 = vtanh.f32 %v695_v59  ;;  %v466_v48 = vand.u32 2147483647, %v1327_v8  ;;  %v440_v30 = vmax.f32 %v1276_v31, 0.0 }
  0xba   : > { %v968_v9 = vpop.eup %967  ;;  %791 = vst.msk [vmem:[%s1301_s27 + $0x80] sm:$0xff] %vm774_vm1, %v758_v60  ;;  %v665_v12 = vmul.f32 0.6931472, %v966_v4  ;;  %979 = vlog2.f32 %v592_v54  ;;  %v572_v33 = vmul.f32 1.442695, %v513_v47  ;;  %v1346_v43 = vadd.f32 %v1232_v34, %v410_v22 }
  0xbb   : > { %v970_v15 = vpop.eup %969  ;;  %799 = vst.msk [vmem:[%s1301_s27 + $0xc0] sm:$0xff] %vm774_vm1, %v766_v5  ;;  %v619_v16 = vmul.f32 0.6931472, %v968_v9  ;;  %981 = vlog2.f32 %v600_v62  ;;  %v498_v26 = vsub.f32 0.0, %v466_v48  ;;  %v526_v40 = vmul.f32 1.442695, %v490_v21 }
  0xbc   : > { %v972_v18 = vpop.eup %971  ;;  %v703_v19 = vadd.f32 %v665_v12, %v447_v37  ;;  %v608_v20 = vadd.f32 1.0, %v970_v15  ;;  %983 = vpow2.f32 %v540_v0  ;;  %v474_v41 = vand.u32 2147483647, %v1336_v17 }
  0xbd   : > { %v974_v23 = vpop.eup %973  ;;  %v680_v24 = vadd.f32 %v619_v16, %v424_v38  ;;  %v585_v25 = vadd.f32 1.0, %v972_v18  ;;  %985 = vpow2.f32 %v556_v7  ;;  %v1351_v49 = vadd.f32 %v1232_v34, %v341_v35  ;;  %v413_v15 = vpop.f32.mrf.mxu3 }
  0xbe   : > { %v976_v28 = vpop.eup %975  ;;  %v743_v29 = vmul.f32 %v974_v23, %v1249_v51  ;;  %987 = vtanh.f32 %v703_v19  ;;  %v542_v51 = vmul.f32 1.442695, %v498_v26  ;;  %v506_v46 = vsub.f32 0.0, %v474_v41 }
  0xbf   : > { %v978_v37 = vpop.eup %977  ;;  %v751_v39 = vmul.f32 %v976_v28, %v1252_v52  ;;  %989 = vtanh.f32 %v680_v24  ;;  %v482_v54 = vand.u32 2147483647, %v1346_v43  ;;  %v1360_v59 = vadd.f32 %v1232_v34, %v365_v44  ;;  %v368_v44 = vpop.f32.mrf.mxu1 }
  0xc0   : > { %v980_v38 = vpop.eup %979  ;;  %776 = vst.msk [vmem:[%s1301_s27 + $0x8] sm:$0xff] %vm774_vm1, %v743_v29  ;;  %v759_v42 = vmul.f32 %v978_v37, %v1259_v6  ;;  %991 = vlog2.f32 %v608_v20  ;;  %v448_v6 = vmax.f32 %v1280_v36, 0.0  ;;  %v558_v5 = vmul.f32 1.442695, %v506_v46 }
  0xc1   : > { %v982_v45 = vpop.eup %981  ;;  %784 = vst.msk [vmem:[%s1301_s27 + $0x48] sm:$0xff] %vm774_vm1, %v751_v39  ;;  %v635_v52 = vmul.f32 0.6931472, %v980_v38  ;;  %993 = vlog2.f32 %v585_v25  ;;  %v514_v0 = vsub.f32 0.0, %v482_v54  ;;  %v459_v7 = vand.u32 2147483647, %v1351_v49 }
  0xc2   : > { %v984_v50 = vpop.eup %983  ;;  %792 = vst.msk [vmem:[%s1301_s27 + $0x88] sm:$0xff] %vm774_vm1, %v759_v42  ;;  %v651_v53 = vmul.f32 0.6931472, %v982_v45  ;;  %995 = vpow2.f32 %v572_v33  ;;  %v425_v47 = vmax.f32 %v1286_v57, 0.0  ;;  %v467_v18 = vand.u32 2147483647, %v1360_v59 }
  0xc3   : > { %v986_v55 = vpop.eup %985  ;;  %v688_v56 = vadd.f32 %v635_v52, %v432_v61  ;;  %v593_v58 = vadd.f32 1.0, %v984_v50  ;;  %997 = vpow2.f32 %v526_v40  ;;  %v389_v61 = vpop.f32.mrf.mxu2  ;;  %v574_v14 = vmul.f32 1.442695, %v514_v0 }
  0xc4   : > { %v988_v62 = vpop.eup %987  ;;  %v696_v63 = vadd.f32 %v651_v53, %v440_v30  ;;  %v601_v60 = vadd.f32 1.0, %v986_v55  ;;  %999 = vpow2.f32 %v542_v51  ;;  %v1373_v21 = vadd.f32 %v1232_v34, %v389_v61  ;;  %v344_v40 = vpop.f32.mrf.mxu0 }
  0xc5   : > { %v990_v3 = vpop.eup %989  ;;  %v767_v4 = vmul.f32 %v988_v62, %v1262_v10  ;;  %1001 = vtanh.f32 %v688_v56  ;;  %v433_v10 = vmax.f32 %v1291_v1, 0.0  ;;  %v1376_v25 = vadd.f32 %v1232_v34, %v413_v15  ;;  %v416_v15 = vpop.f32.mrf.mxu3 }
  0xc6   : > { %v992_v9 = vpop.eup %991  ;;  %v744_v12 = vmul.f32 %v990_v3, %v1265_v11  ;;  %1003 = vtanh.f32 %v696_v63  ;;  %v491_v11 = vsub.f32 0.0, %v459_v7  ;;  %v499_v30 = vsub.f32 0.0, %v467_v18 }
  0xc7   : > { %v994_v16 = vpop.eup %993  ;;  %800 = vst.msk [vmem:[%s1301_s27 + $0xc8] sm:$0xff] %vm774_vm1, %v767_v4  ;;  %v667_v48 = vmul.f32 0.6931472, %v992_v9  ;;  %1005 = vlog2.f32 %v593_v58  ;;  %v441_v35 = vmax.f32 %v1306_v27, 0.0  ;;  %v475_v39 = vand.u32 2147483647, %v1373_v21 }
  0xc8   : > { %v996_v19 = vpop.eup %995  ;;  %777 = vst.msk [vmem:[%s1301_s27 + $0x10] sm:$0xff] %vm774_vm1, %v744_v12  ;;  %v621_v20 = vmul.f32 0.6931472, %v994_v16  ;;  %1007 = vlog2.f32 %v601_v60  ;;  %v449_v42 = vmax.f32 %v1310_v32, 0.0  ;;  %v528_v51 = vmul.f32 1.442695, %v491_v11 }
  0xc9   : > { %v998_v22 = vpop.eup %997  ;;  %v704_v23 = vadd.f32 %v667_v48, %v448_v6  ;;  %v609_v24 = vadd.f32 1.0, %v996_v19  ;;  %1009 = vpow2.f32 %v558_v5  ;;  %v544_v46 = vmul.f32 1.442695, %v499_v30 }
  0xca   : > { %v1000_v26 = vpop.eup %999  ;;  %v681_v28 = vadd.f32 %v621_v20, %v425_v47  ;;  %v586_v29 = vadd.f32 1.0, %v998_v22  ;;  %1011 = vpow2.f32 %v574_v14  ;;  %v483_v50 = vand.u32 2147483647, %v1376_v25 }
  0xcb   : > { %v1002_v33 = vpop.eup %1001  ;;  %1013 = vtanh.f32 %v704_v23  ;;  %v594_v37 = vadd.f32 1.0, %v1000_v26  ;;  %v507_v54 = vsub.f32 0.0, %v475_v39  ;;  %v426_v60 = vmax.f32 %v1323_v2, 0.0  ;;  %v392_v61 = vpop.f32.mrf.mxu2 }
  0xcc   : > { %v1004_v41 = vpop.eup %1003  ;;  %v752_v38 = vmul.f32 %v1002_v33, %v1269_v13  ;;  %1015 = vtanh.f32 %v681_v28  ;;  %v1387_v13 = vadd.f32 %v1232_v34, %v344_v40  ;;  %v515_v58 = vsub.f32 0.0, %v483_v50  ;;  %v347_v40 = vpop.f32.mrf.mxu0 }
  0xcd   : > { %v1006_v45 = vpop.eup %1005  ;;  %v760_v52 = vmul.f32 %v1004_v41, %v1276_v31  ;;  %1017 = vlog2.f32 %v609_v24  ;;  %v1392_v31 = vadd.f32 %v1232_v34, %v368_v44  ;;  %v434_v5 = vmax.f32 %v1327_v8, 0.0 }
  0xce   : > { %v1008_v53 = vpop.eup %1007  ;;  %785 = vst.msk [vmem:[%s1301_s27 + $0x50] sm:$0xff] %vm774_vm1, %v752_v38  ;;  %v637_v6 = vmul.f32 0.6931472, %v1006_v45  ;;  %1019 = vlog2.f32 %v586_v29  ;;  %v560_v47 = vmul.f32 1.442695, %v507_v54  ;;  %v442_v30 = vmax.f32 %v1336_v17, 0.0  ;;  %v371_v45 = vpop.f32.mrf.mxu1 }
  0xcf   : > { %v1010_v55 = vpop.eup %1009  ;;  %793 = vst.msk [vmem:[%s1301_s27 + $0x90] sm:$0xff] %vm774_vm1, %v760_v52  ;;  %v653_v56 = vmul.f32 0.6931472, %v1008_v53  ;;  %1021 = vlog2.f32 %v594_v37  ;;  %v460_v14 = vand.u32 2147483647, %v1387_v13 }
  0xd0   : > { %v1012_v62 = vpop.eup %1011  ;;  %v689_v63 = vadd.f32 %v637_v6, %v433_v10  ;;  %v602_v0 = vadd.f32 1.0, %v1010_v55  ;;  %1023 = vpow2.f32 %v528_v51  ;;  %v576_v10 = vmul.f32 1.442695, %v515_v58 }
  0xd1   : > { %v1014_v3 = vpop.eup %1013  ;;  %v697_v4 = vadd.f32 %v653_v56, %v441_v35  ;;  %v610_v7 = vadd.f32 1.0, %v1012_v62  ;;  %1025 = vpow2.f32 %v544_v46  ;;  %v468_v18 = vand.u32 2147483647, %v1392_v31 }
  0xd2   : > { %v1016_v9 = vpop.eup %1015  ;;  %v768_v12 = vmul.f32 %v1014_v3, %v1280_v36  ;;  %1027 = vtanh.f32 %v689_v63  ;;  %v492_v11 = vsub.f32 0.0, %v460_v14  ;;  %v1403_v36 = vadd.f32 %v1232_v34, %v392_v61  ;;  %v419_v14 = vpop.f32.mrf.mxu3 }
  0xd3   : > { %v1018_v16 = vpop.eup %1017  ;;  %v745_v48 = vmul.f32 %v1016_v9, %v1286_v57  ;;  %1029 = vtanh.f32 %v697_v4  ;;  %v500_v24 = vsub.f32 0.0, %v468_v18  ;;  %v1408_v57 = vadd.f32 %v1232_v34, %v416_v15 }
  0xd4   : > { %v1020_v19 = vpop.eup %1019  ;;  %801 = vst.msk [vmem:[%s1301_s27 + $0xd0] sm:$0xff] %vm774_vm1, %v768_v12  ;;  %v669_v20 = vmul.f32 0.6931472, %v1018_v16  ;;  %1031 = vlog2.f32 %v602_v0  ;;  %v530_v39 = vmul.f32 1.442695, %v492_v11  ;;  %v1416_v55 = vadd.f32 %v1232_v34, %v347_v40 }
  0xd5   : > { %v1022_v22 = vpop.eup %1021  ;;  %778 = vst.msk [vmem:[%s1301_s27 + $0x18] sm:$0xff] %vm774_vm1, %v745_v48  ;;  %v623_v23 = vmul.f32 0.6931472, %v1020_v19  ;;  %1033 = vlog2.f32 %v610_v7  ;;  %v476_v44 = vand.u32 2147483647, %v1403_v36  ;;  %v395_v7 = vpop.f32.mrf.mxu2 }
  0xd6   : > { %v1024_v26 = vpop.eup %1023  ;;  %v705_v28 = vadd.f32 %v669_v20, %v449_v42  ;;  %v639_v29 = vmul.f32 0.6931472, %v1022_v22  ;;  %1035 = vpow2.f32 %v560_v47  ;;  %v546_v46 = vmul.f32 1.442695, %v500_v24 }
  0xd7   : > { %v1026_v33 = vpop.eup %1025  ;;  %v682_v35 = vadd.f32 %v623_v23, %v426_v60  ;;  %v587_v37 = vadd.f32 1.0, %v1024_v26  ;;  %1037 = vpow2.f32 %v576_v10  ;;  %v484_v50 = vand.u32 2147483647, %v1408_v57 }
  0xd8   : > { %v1028_v41 = vpop.eup %1027  ;;  %1039 = vtanh.f32 %v705_v28  ;;  %v690_v38 = vadd.f32 %v639_v29, %v434_v5  ;;  %v595_v51 = vadd.f32 1.0, %v1026_v33  ;;  %v508_v54 = vsub.f32 0.0, %v476_v44 }
  0xd9   : > { %v1030_v52 = vpop.eup %1029  ;;  %v753_v42 = vmul.f32 %v1028_v41, %v1291_v1  ;;  %1041 = vtanh.f32 %v682_v35  ;;  %v516_v62 = vsub.f32 0.0, %v484_v50  ;;  %v1421_v1 = vadd.f32 %v1232_v34, %v371_v45 }
  0xda   : > { %v1032_v53 = vpop.eup %1031  ;;  %v761_v6 = vmul.f32 %v1030_v52, %v1306_v27  ;;  %1043 = vtanh.f32 %v690_v38  ;;  %v450_v60 = vmax.f32 %v1346_v43, 0.0  ;;  %v562_v5 = vmul.f32 1.442695, %v508_v54 }
  0xdb   : > { %v1034_v56 = vpop.eup %1033  ;;  %786 = vst.msk [vmem:[%s1301_s27 + $0x58] sm:$0xff] %vm774_vm1, %v753_v42  ;;  %v655_v58 = vmul.f32 0.6931472, %v1032_v53  ;;  %1045 = vlog2.f32 %v587_v37  ;;  %v461_v47 = vand.u32 2147483647, %v1416_v55  ;;  %v1431_v11 = vadd.f32 %v1232_v34, %v395_v7 }
  0xdc   : > { %v1036_v63 = vpop.eup %1035  ;;  %794 = vst.msk [vmem:[%s1301_s27 + $0x98] sm:$0xff] %vm774_vm1, %v761_v6  ;;  %v671_v27 = vmul.f32 0.6931472, %v1034_v56  ;;  %1047 = vlog2.f32 %v595_v51  ;;  %v578_v48 = vmul.f32 1.442695, %v516_v62  ;;  %v1438_v24 = vadd.f32 %v1232_v34, %v419_v14 }
  0xdd   : > { %v1038_v0 = vpop.eup %1037  ;;  %v698_v3 = vadd.f32 %v655_v58, %v442_v30  ;;  %v603_v4 = vadd.f32 1.0, %v1036_v63  ;;  %1049 = vpow2.f32 %v530_v39  ;;  %v469_v10 = vand.u32 2147483647, %v1421_v1 }
  0xde   : > { %v1040_v61 = vpop.eup %1039  ;;  %v706_v9 = vadd.f32 %v671_v27, %v450_v60  ;;  %v611_v12 = vadd.f32 1.0, %v1038_v0  ;;  %1051 = vpow2.f32 %v546_v46  ;;  %v493_v20 = vsub.f32 0.0, %v461_v47 }
  0xdf   : > { %v1042_v15 = vpop.eup %1041  ;;  %v769_v16 = vmul.f32 %v1040_v61, %v1310_v32  ;;  %1053 = vtanh.f32 %v698_v3  ;;  %v427_v32 = vmax.f32 %v1351_v49, 0.0  ;;  %v501_v29 = vsub.f32 0.0, %v469_v10 }
  0xe0   : > { %v1044_v18 = vpop.eup %1043  ;;  %v746_v19 = vmul.f32 %v1042_v15, %v1323_v2  ;;  %1055 = vtanh.f32 %v706_v9  ;;  %v532_v28 = vmul.f32 1.442695, %v493_v20  ;;  %v435_v33 = vmax.f32 %v1360_v59, 0.0 }
  0xe1   : > { %v1046_v22 = vpop.eup %1045  ;;  %802 = vst.msk [vmem:[%s1301_s27 + $0xd8] sm:$0xff] %vm774_vm1, %v769_v16  ;;  %v754_v23 = vmul.f32 %v1044_v18, %v1327_v8  ;;  %1057 = vlog2.f32 %v603_v4  ;;  %v477_v34 = vand.u32 2147483647, %v1431_v11  ;;  %v485_v51 = vand.u32 2147483647, %v1438_v24 }
  0xe2   : > { %v1048_v26 = vpop.eup %1047  ;;  %779 = vst.msk [vmem:[%s1301_s27 + $0x20] sm:$0xff] %vm774_vm1, %v746_v19  ;;  %v625_v2 = vmul.f32 0.6931472, %v1046_v22  ;;  %1059 = vlog2.f32 %v611_v12  ;;  %v548_v52 = vmul.f32 1.442695, %v501_v29  ;;  %v443_v6 = vmax.f32 %v1373_v21, 0.0 }
  0xe3   : > { %v1050_v30 = vpop.eup %1049  ;;  %787 = vst.msk [vmem:[%s1301_s27 + $0x60] sm:$0xff] %vm774_vm1, %v754_v23  ;;  %v641_v35 = vmul.f32 0.6931472, %v1048_v26  ;;  %1061 = vpow2.f32 %v562_v5  ;;  %v509_v42 = vsub.f32 0.0, %v477_v34  ;;  %v517_v63 = vsub.f32 0.0, %v485_v51 }
  0xe4   : > { %v1052_v8 = vpop.eup %1051  ;;  %v683_v37 = vadd.f32 %v625_v2, %v427_v32  ;;  %v588_v39 = vadd.f32 1.0, %v1050_v30  ;;  %1063 = vpow2.f32 %v578_v48  ;;  %v428_v16 = vmax.f32 %v1387_v13, 0.0 }
  0xe5   : > { %v1054_v40 = vpop.eup %1053  ;;  %v691_v41 = vadd.f32 %v641_v35, %v435_v33  ;;  %v596_v38 = vadd.f32 1.0, %v1052_v8  ;;  %1065 = vpow2.f32 %v532_v28  ;;  %v564_v56 = vmul.f32 1.442695, %v509_v42 }
  0xe6   : > { %v1056_v44 = vpop.eup %1055  ;;  %v762_v45 = vmul.f32 %v1054_v40, %v1336_v17  ;;  %1067 = vtanh.f32 %v683_v37  ;;  %v451_v17 = vmax.f32 %v1376_v25, 0.0  ;;  %v580_v12 = vmul.f32 1.442695, %v517_v63 }
  0xe7   : > { %v1058_v46 = vpop.eup %1057  ;;  %v770_v50 = vmul.f32 %v1056_v44, %v1346_v43  ;;  %1069 = vtanh.f32 %v691_v41  ;;  %v436_v18 = vmax.f32 %v1392_v31, 0.0  ;;  %v444_v33 = vmax.f32 %v1403_v36, 0.0 }
  0xe8   : > { %v1060_v53 = vpop.eup %1059  ;;  %795 = vst.msk [vmem:[%s1301_s27 + $0xa0] sm:$0xff] %vm774_vm1, %v762_v45  ;;  %v657_v54 = vmul.f32 0.6931472, %v1058_v46  ;;  %1071 = vlog2.f32 %v588_v39  ;;  %v452_v37 = vmax.f32 %v1408_v57, 0.0 }
  0xe9   : > { %v1062_v58 = vpop.eup %1061  ;;  %803 = vst.msk [vmem:[%s1301_s27 + $0xe0] sm:$0xff] %vm774_vm1, %v770_v50  ;;  %v673_v62 = vmul.f32 0.6931472, %v1060_v53  ;;  %1073 = vlog2.f32 %v596_v38  ;;  %v437_v53 = vmax.f32 %v1421_v1, 0.0 }
  0xea   : > { %v1064_v60 = vpop.eup %1063  ;;  %v699_v27 = vadd.f32 %v657_v54, %v443_v6  ;;  %v604_v43 = vadd.f32 1.0, %v1062_v58  ;;  %1075 = vpow2.f32 %v548_v52  ;;  %v445_v54 = vmax.f32 %v1431_v11, 0.0 }
  0xeb   : > { %v1066_v0 = vpop.eup %1065  ;;  %v707_v3 = vadd.f32 %v673_v62, %v451_v17  ;;  %v612_v4 = vadd.f32 1.0, %v1064_v60  ;;  %1077 = vpow2.f32 %v564_v56 }
  0xec   : > { %v1068_v5 = vpop.eup %1067  ;;  %1079 = vtanh.f32 %v699_v27  ;;  %v589_v7 = vadd.f32 1.0, %v1066_v0  ;;  %v453_v0 = vmax.f32 %v1438_v24, 0.0 }
  0xed   : > { %v1070_v61 = vpop.eup %1069  ;;  %v747_v9 = vmul.f32 %v1068_v5, %v1351_v49  ;;  %1081 = vtanh.f32 %v707_v3 }
  0xee   : > { %v1072_v47 = vpop.eup %1071  ;;  %v755_v14 = vmul.f32 %v1070_v61, %v1360_v59  ;;  %1083 = vlog2.f32 %v604_v43 }
  0xef   : > { %v1074_v15 = vpop.eup %1073  ;;  %780 = vst.msk [vmem:[%s1301_s27 + $0x28] sm:$0xff] %vm774_vm1, %v747_v9  ;;  %v627_v48 = vmul.f32 0.6931472, %v1072_v47  ;;  %1085 = vlog2.f32 %v612_v4 }
  0xf0   : > { %v1076_v10 = vpop.eup %1075  ;;  %788 = vst.msk [vmem:[%s1301_s27 + $0x68] sm:$0xff] %vm774_vm1, %v755_v14  ;;  %v643_v19 = vmul.f32 0.6931472, %v1074_v15  ;;  %1087 = vlog2.f32 %v589_v7 }
  0xf1   : > { %v1078_v49 = vpop.eup %1077  ;;  %v684_v20 = vadd.f32 %v627_v48, %v428_v16  ;;  %v597_v22 = vadd.f32 1.0, %v1076_v10  ;;  %1089 = vpow2.f32 %v580_v12 }
  0xf2   : > { %v1080_v59 = vpop.eup %1079  ;;  %v692_v23 = vadd.f32 %v643_v19, %v436_v18  ;;  %v605_v32 = vadd.f32 1.0, %v1078_v49 }
  0xf3   : > { %v1082_v26 = vpop.eup %1081  ;;  %v763_v2 = vmul.f32 %v1080_v59, %v1373_v21  ;;  %1091 = vtanh.f32 %v684_v20 }
  0xf4   : > { %v1084_v28 = vpop.eup %1083  ;;  %v771_v29 = vmul.f32 %v1082_v26, %v1376_v25  ;;  %1093 = vtanh.f32 %v692_v23  ;;  %v429_v25 = vmax.f32 %v1416_v55, 0.0 }
  0xf5   : > { %v1086_v30 = vpop.eup %1085  ;;  %796 = vst.msk [vmem:[%s1301_s27 + $0xa8] sm:$0xff] %vm774_vm1, %v763_v2  ;;  %v659_v35 = vmul.f32 0.6931472, %v1084_v28  ;;  %1095 = vlog2.f32 %v597_v22 }
  0xf6   : > { %v1088_v8 = vpop.eup %1087  ;;  %804 = vst.msk [vmem:[%s1301_s27 + $0xe8] sm:$0xff] %vm774_vm1, %v771_v29  ;;  %v675_v39 = vmul.f32 0.6931472, %v1086_v30  ;;  %1097 = vlog2.f32 %v605_v32 }
  0xf7   : > { %v1090_v21 = vpop.eup %1089  ;;  %v700_v34 = vadd.f32 %v659_v35, %v444_v33  ;;  %v629_v40 = vmul.f32 0.6931472, %v1088_v8 }
  0xf8   : > { %v708_v41 = vadd.f32 %v675_v39, %v452_v37  ;;  %v613_v38 = vadd.f32 1.0, %v1090_v21 }
  0xf9   : > { %v1092_v51 = vpop.eup %1091  ;;  %1099 = vtanh.f32 %v700_v34  ;;  %v685_v44 = vadd.f32 %v629_v40, %v429_v25 }
  0xfa   : > { %v1094_v45 = vpop.eup %1093  ;;  %v748_v52 = vmul.f32 %v1092_v51, %v1387_v13  ;;  %1101 = vtanh.f32 %v708_v41 }
  0xfb   : > { %v1096_v42 = vpop.eup %1095  ;;  %v756_v46 = vmul.f32 %v1094_v45, %v1392_v31  ;;  %1103 = vtanh.f32 %v685_v44 }
  0xfc   : > { %v1098_v50 = vpop.eup %1097  ;;  %781 = vst.msk [vmem:[%s1301_s27 + $0x30] sm:$0xff] %vm774_vm1, %v748_v52  ;;  %v645_v6 = vmul.f32 0.6931472, %v1096_v42  ;;  %1105 = vlog2.f32 %v613_v38 }
  0xfd   : > { %789 = vst.msk [vmem:[%s1301_s27 + $0x70] sm:$0xff] %vm774_vm1, %v756_v46  ;;  %v661_v56 = vmul.f32 0.6931472, %v1098_v50 }
  0xfe   : > { %v693_v13 = vadd.f32 %v645_v6, %v437_v53 }
  0xff   : > { %v1100_v58 = vpop.eup %1099  ;;  %v701_v17 = vadd.f32 %v661_v56, %v445_v54 }
 0x100   : > { %v1102_v31 = vpop.eup %1101  ;;  %v764_v62 = vmul.f32 %v1100_v58, %v1403_v36  ;;  %1107 = vtanh.f32 %v693_v13 }
 0x101   : > { %v1104_v63 = vpop.eup %1103  ;;  %v772_v60 = vmul.f32 %v1102_v31, %v1408_v57  ;;  %1109 = vtanh.f32 %v701_v17 }
 0x102   : > { %v1106_v27 = vpop.eup %1105  ;;  %797 = vst.msk [vmem:[%s1301_s27 + $0xb0] sm:$0xff] %vm774_vm1, %v764_v62  ;;  %v749_v43 = vmul.f32 %v1104_v63, %v1416_v55 }
 0x103   : > { %805 = vst.msk [vmem:[%s1301_s27 + $0xf0] sm:$0xff] %vm774_vm1, %v772_v60  ;;  %v677_v3 = vmul.f32 0.6931472, %v1106_v27 }
 0x104   : > { %782 = vst.msk [vmem:[%s1301_s27 + $0x38] sm:$0xff] %vm774_vm1, %v749_v43 }
 0x105   : > { %v709_v36 = vadd.f32 %v677_v3, %v453_v0 }
 0x106   : > { %v1108_v4 = vpop.eup %1107 }
 0x107   : > { %v1110_v5 = vpop.eup %1109  ;;  %v757_v57 = vmul.f32 %v1108_v4, %v1421_v1  ;;  %1111 = vtanh.f32 %v709_v36 }
 0x108   : > { %v765_v7 = vmul.f32 %v1110_v5, %v1431_v11 }
 0x109   : > { %790 = vst.msk [vmem:[%s1301_s27 + $0x78] sm:$0xff] %vm774_vm1, %v757_v57 }
 0x10a   : > { %798 = vst.msk [vmem:[%s1301_s27 + $0xb8] sm:$0xff] %vm774_vm1, %v765_v7 }
 0x10d   : > { %v1112_v55 = vpop.eup %1111 }
 0x10e   : > { %v773_v61 = vmul.f32 %v1112_v55, %v1438_v24 }
 0x110   : > { %806 = vst.msk [vmem:[%s1301_s27 + $0xf8] sm:$0xff] %vm774_vm1, %v773_v61 }
 0x111 PF: > { %s13_s12 = sadd.s32 1, %s1119_s12  }
 0x112   : > { %p10_p4 = scmp.ge.s32.totalorder %s13_s12, 4  }
 0x114   :  { %12 = sbr.rel (!%p10_p4) target bundleno = 1 (0x1), region = 62 }

</bundles_post_ra>
